<compile_context>
chip_gen: v5e
topology: v5e:2x2
jax: 0.10.0
libtpu: 0.0.40
codegen_flags: <defaults>
</compile_context>

<pallas_src>
import jax
import jax.numpy as jnp
from jax.experimental import pallas as pl
from jax.experimental.pallas import tpu as pltpu


def _activation(act_type):
    if act_type == 1:
        return lambda h: jnp.maximum(h, 0.0)
    if act_type == 2:
        return jnp.tanh
    if act_type == 3:
        return jax.nn.sigmoid
    return lambda h: h  # torch module appends no activation for other values


def make_vae_kernel(n_enc, n_dec, latent, act_type):
    act = _activation(act_type)
    n_param_refs = 2 * (n_enc + 1 + n_dec)  # encoder pairs + fused head pair + decoder pairs

    def kernel(*refs):
        x_ref, eps_ref = refs[0], refs[1]
        p = refs[2:2 + n_param_refs]
        dec_ref = refs[2 + n_param_refs]    # (tile_b, d_in)   decoded output
        heads_ref = refs[3 + n_param_refs]  # (tile_b, 2*latent) [z_mean | z_logvar]

        h = x_ref[...].astype(jnp.float32)
        idx = 0

        # ---- encoder: Linear(+act) * (n_enc-1), then final Linear (no act) ----
        for i in range(n_enc):
            w = p[idx][...]
            b = p[idx + 1][...]
            idx += 2
            h = jnp.dot(h, w, preferred_element_type=jnp.float32) + b
            if i < n_enc - 1:
                h = act(h)

        # ---- fused z_mean / z_logvar head: single matmul ----
        w_head = p[idx][...]
        b_head = p[idx + 1][...]
        idx += 2
        heads = jnp.dot(h, w_head, preferred_element_type=jnp.float32) + b_head

        # Store the head output immediately (before the decoder loop) so it is not
        # kept live across the decoder -> lower vreg pressure, no end-of-kernel concat.
        heads_ref[...] = heads.astype(heads_ref.dtype)

        # ---- reparameterize: z = mu + eps * exp(0.5 * logvar) (reads only) ----
        z_mu = heads[:, :latent]
        z_lv = heads[:, latent:2 * latent]
        z = z_mu + eps_ref[...].astype(jnp.float32) * jnp.exp(0.5 * z_lv)

        # ---- decoder: Linear+act * (n_dec-1), then final Linear (no act) ----
        h = z
        for i in range(n_dec):
            w = p[idx][...]
            b = p[idx + 1][...]
            idx += 2
            h = jnp.dot(h, w, preferred_element_type=jnp.float32) + b
            if i < n_dec - 1:
                h = act(h)

        dec_ref[...] = h.astype(dec_ref.dtype)

    return kernel


def init_vae_params(key, units):
    """Deterministic parameter init. Returns flat list [(W_in_out, b_1_out), ...] in the
    order: encoder layers, z_mean, z_logvar, decoder layers (mirrors the torch module)."""
    dims = []
    for i in range(len(units) - 3):
        dims.append((units[i], units[i + 1]))
    dims.append((units[-3], units[-2]))
    dims.append((units[-2], units[-1]))  # z_mean
    dims.append((units[-2], units[-1]))  # z_logvar
    for i in range(len(units) - 2):
        dims.append((units[-1 - i], units[-2 - i]))
    dims.append((units[1], units[0]))

    params = []
    for (fan_in, fan_out) in dims:
        key, kw, kb = jax.random.split(key, 3)
        bound = 1.0 / jnp.sqrt(fan_in)
        # PyTorch Linear stores (out, in); we store the transpose (in, out).
        w = jax.random.uniform(kw, (fan_in, fan_out), jnp.float32, -bound, bound)
        b = jax.random.uniform(kb, (1, fan_out), jnp.float32, -bound, bound)
        params.append((w, b))
    n_enc = (len(units) - 3) + 1
    n_dec = (len(units) - 2) + 1
    return params, n_enc, n_dec


def _pick_tile_b(batch, requested):
    """Pick a batch tile that divides B exactly (no wrapper-side jnp.pad round trip).
    Block sublane dim must be a multiple of 8 unless it equals the full batch."""
    if batch <= requested:
        return batch
    t = min(requested, batch)
    t -= t % 8
    while t >= 8:
        if batch % t == 0:
            return t
        t -= 8
    return batch  # fall back to one full-batch tile


def vae_forward_pallas(x, eps, params, units, act_type=2, tile_b=128):
    n_enc = (len(units) - 3) + 1
    n_dec = (len(units) - 2) + 1
    d_in = units[0]
    latent = units[-1]
    B = x.shape[0]

    # ---- fuse mu / logvar heads into one weight / bias (single matmul in-kernel) ----
    enc_params = params[:n_enc]
    w_mu, b_mu = params[n_enc]
    w_lv, b_lv = params[n_enc + 1]
    dec_params = params[n_enc + 2:]
    w_head = jnp.concatenate([w_mu, w_lv], axis=1)
    b_head = jnp.concatenate([b_mu, b_lv], axis=1)
    ordered = list(enc_params) + [(w_head, b_head)] + list(dec_params)

    flat_params = []
    for (w, b) in ordered:
        flat_params.append(w.astype(jnp.float32))
        flat_params.append(b.astype(jnp.float32))

    # ---- batch tiling: tile_b divides B exactly, so no input padding is needed ----
    tile_b = _pick_tile_b(B, tile_b)
    n_tiles = B // tile_b

    in_specs = [
        pl.BlockSpec((tile_b, d_in), lambda i: (i, 0)),
        pl.BlockSpec((tile_b, latent), lambda i: (i, 0)),
    ]
    # Constant index_map -> weight/bias blocks DMA'd once, VMEM-resident across steps.
    for arr in flat_params:
        in_specs.append(pl.BlockSpec(arr.shape, lambda i, _nd=arr.ndim: (0,) * _nd))

    out_specs = [
        pl.BlockSpec((tile_b, d_in), lambda i: (i, 0)),        # decoded
        pl.BlockSpec((tile_b, 2 * latent), lambda i: (i, 0)),  # [z_mean | z_logvar]
    ]
    out_shape = [
        jax.ShapeDtypeStruct((B, d_in), jnp.float32),
        jax.ShapeDtypeStruct((B, 2 * latent), jnp.float32),
    ]

    # ---- cost estimate (matmul flops, tanh/sigmoid + exp transcendentals, DMA bytes) ----
    layer_dims = [(int(w.shape[0]), int(w.shape[1])) for (w, b) in ordered]
    flops = 2 * B * sum(fi * fo for fi, fo in layer_dims)
    trans = B * latent  # exp in reparameterize
    if act_type in (2, 3):
        trans += B * sum(layer_dims[i][1] for i in range(n_enc - 1))
        trans += B * sum(layer_dims[n_enc + 1 + i][1] for i in range(n_dec - 1))
    bytes_accessed = int(
        x.size * 4 + eps.size * 4
        + sum(int(a.size) * a.dtype.itemsize for a in flat_params)
        + B * (d_in + 2 * latent) * 4
    )
    cost = pl.CostEstimate(flops=int(flops), transcendentals=int(trans),
                           bytes_accessed=bytes_accessed)

    kernel = make_vae_kernel(n_enc, n_dec, latent, act_type)

    fn = pl.pallas_call(
        kernel,
        out_shape=out_shape,
        grid_spec=pltpu.PrefetchScalarGridSpec(
            num_scalar_prefetch=0,
            grid=(n_tiles,),
            in_specs=in_specs,
            out_specs=out_specs,
        ),
        compiler_params=pltpu.CompilerParams(
            dimension_semantics=("parallel",),  # batch tiles shard across TCs on v7x
        ),
        cost_estimate=cost,
    )
    decoded, heads = fn(x, eps, *flat_params)

    z_mean = heads[:, :latent]
    z_logvar = heads[:, latent:]
    return decoded, z_mean, z_logvar


def vae_forward_ref(x, eps, params, units, act_type=2):
    """Pure-JAX reference mirroring the PyTorch module semantics."""
    act = _activation(act_type)
    n_enc = (len(units) - 3) + 1
    n_dec = (len(units) - 2) + 1
    idx = 0
    h = x
    for i in range(n_enc):
        w, b = params[idx]; idx += 1
        h = h @ w + b
        if i < n_enc - 1:
            h = act(h)
    w_mu, b_mu = params[idx]; idx += 1
    w_lv, b_lv = params[idx]; idx += 1
    z_mu = h @ w_mu + b_mu
    z_lv = h @ w_lv + b_lv
    z = z_mu + eps * jnp.exp(0.5 * z_lv)
    h = z
    for i in range(n_dec):
        w, b = params[idx]; idx += 1
        h = h @ w + b
        if i < n_dec - 1:
            h = act(h)
    return h, z_mu, z_lv


if __name__ == "__main__":
    units = [32, 24, 16, 8]   # units[0]=input dim, units[-1]=latent dim
    act_type = 2              # Tanh (module default)
    batch = 64
    tile_b = 32               # grid=(2,): >=2 steps total, exercises the BlockSpec pipeline

    key = jax.random.PRNGKey(0)
    kx, keps, kparams = jax.random.split(key, 3)

    x = jax.random.normal(kx, (batch, units[0]), jnp.float32)
    # TODO(synk): torch.randn_like inside reparameterize is stochastic; we pass a
    # deterministic eps tensor instead (same distribution, fixed seed).
    eps = jax.random.normal(keps, (batch, units[-1]), jnp.float32)

    params, n_enc, n_dec = init_vae_params(kparams, units)

    decoded, z_mean, z_logvar = vae_forward_pallas(x, eps, params, units, act_type,
                                                   tile_b=tile_b)
    jax.block_until_ready(decoded)
    jax.block_until_ready(z_mean)
    jax.block_until_ready(z_logvar)

    d_ref, m_ref, lv_ref = vae_forward_ref(x, eps, params, units, act_type)
    assert decoded.shape == (batch, units[0])
    assert z_mean.shape == (batch, units[-1]) and z_logvar.shape == (batch, units[-1])
    assert jnp.allclose(decoded, d_ref, atol=1e-4, rtol=1e-4)
    assert jnp.allclose(z_mean, m_ref, atol=1e-4, rtol=1e-4)
    assert jnp.allclose(z_logvar, lv_ref, atol=1e-4, rtol=1e-4)

    print("KERNEL_OK")
</pallas_src>

<mosaic_0001>
module attributes {stable_mosaic.version = 11 : i64} {
  func.func @kernel(%arg0: i32, %arg1: memref<32x32xf32, #tpu.memory_space<vmem>>, %arg2: memref<32x8xf32, #tpu.memory_space<vmem>>, %arg3: memref<32x24xf32, #tpu.memory_space<vmem>>, %arg4: memref<1x24xf32, #tpu.memory_space<vmem>>, %arg5: memref<24x16xf32, #tpu.memory_space<vmem>>, %arg6: memref<1x16xf32, #tpu.memory_space<vmem>>, %arg7: memref<16x16xf32, #tpu.memory_space<vmem>>, %arg8: memref<1x16xf32, #tpu.memory_space<vmem>>, %arg9: memref<8x16xf32, #tpu.memory_space<vmem>>, %arg10: memref<1x16xf32, #tpu.memory_space<vmem>>, %arg11: memref<16x24xf32, #tpu.memory_space<vmem>>, %arg12: memref<1x24xf32, #tpu.memory_space<vmem>>, %arg13: memref<24x32xf32, #tpu.memory_space<vmem>>, %arg14: memref<1x32xf32, #tpu.memory_space<vmem>>, %arg15: memref<32x32xf32, #tpu.memory_space<vmem>>, %arg16: memref<32x16xf32, #tpu.memory_space<vmem>>) attributes {dimension_semantics = [#tpu.dimension_semantics<parallel>], iteration_bounds = array<i64: 2>, scalar_prefetch = 0 : i64, scratch_operands = 0 : i64, tpu.core_type = #tpu.core_type<tc>, window_params = [{transform_indices = @transform_0, window_bounds = array<i64: 32, 32>}, {transform_indices = @transform_1, window_bounds = array<i64: 32, 8>}, {pipeline_mode = #tpu.pipeline_mode<synchronous>, transform_indices = @transform_2, window_bounds = array<i64: 32, 24>}, {pipeline_mode = #tpu.pipeline_mode<synchronous>, transform_indices = @transform_3, window_bounds = array<i64: 1, 24>}, {pipeline_mode = #tpu.pipeline_mode<synchronous>, transform_indices = @transform_4, window_bounds = array<i64: 24, 16>}, {pipeline_mode = #tpu.pipeline_mode<synchronous>, transform_indices = @transform_5, window_bounds = array<i64: 1, 16>}, {pipeline_mode = #tpu.pipeline_mode<synchronous>, transform_indices = @transform_6, window_bounds = array<i64: 16, 16>}, {pipeline_mode = #tpu.pipeline_mode<synchronous>, transform_indices = @transform_7, window_bounds = array<i64: 1, 16>}, {pipeline_mode = #tpu.pipeline_mode<synchronous>, transform_indices = @transform_8, window_bounds = array<i64: 8, 16>}, {pipeline_mode = #tpu.pipeline_mode<synchronous>, transform_indices = @transform_9, window_bounds = array<i64: 1, 16>}, {pipeline_mode = #tpu.pipeline_mode<synchronous>, transform_indices = @transform_10, window_bounds = array<i64: 16, 24>}, {pipeline_mode = #tpu.pipeline_mode<synchronous>, transform_indices = @transform_11, window_bounds = array<i64: 1, 24>}, {pipeline_mode = #tpu.pipeline_mode<synchronous>, transform_indices = @transform_12, window_bounds = array<i64: 24, 32>}, {pipeline_mode = #tpu.pipeline_mode<synchronous>, transform_indices = @transform_13, window_bounds = array<i64: 1, 32>}, {transform_indices = @transform_14, window_bounds = array<i64: 32, 32>}, {transform_indices = @transform_15, window_bounds = array<i64: 32, 16>}]} {
    %c0 = arith.constant 0 : index
    %c0_0 = arith.constant 0 : index
    %0 = vector.load %arg1[%c0, %c0_0] : memref<32x32xf32, #tpu.memory_space<vmem>>, vector<32x32xf32>
    %c0_1 = arith.constant 0 : index
    %c0_2 = arith.constant 0 : index
    %1 = vector.load %arg3[%c0_1, %c0_2] : memref<32x24xf32, #tpu.memory_space<vmem>>, vector<32x24xf32>
    %c0_3 = arith.constant 0 : index
    %c0_4 = arith.constant 0 : index
    %2 = vector.load %arg4[%c0_3, %c0_4] : memref<1x24xf32, #tpu.memory_space<vmem>>, vector<1x24xf32>
    %cst = arith.constant dense<0.000000e+00> : vector<32x24xf32>
    %3 = tpu.matmul %0, %1, %cst {dimension_numbers = #tpu.dot_dimension_numbers<[1], [0], [0], [1], [0, 0, 1, 1], [], []>} : vector<32x32xf32>, vector<32x24xf32>, vector<32x24xf32> -> vector<32x24xf32>
    %4 = vector.broadcast %2 : vector<1x24xf32> to vector<32x24xf32>
    %5 = arith.addf %3, %4 : vector<32x24xf32>
    %6 = math.tanh %5 : vector<32x24xf32>
    %c0_5 = arith.constant 0 : index
    %c0_6 = arith.constant 0 : index
    %7 = vector.load %arg5[%c0_5, %c0_6] : memref<24x16xf32, #tpu.memory_space<vmem>>, vector<24x16xf32>
    %c0_7 = arith.constant 0 : index
    %c0_8 = arith.constant 0 : index
    %8 = vector.load %arg6[%c0_7, %c0_8] : memref<1x16xf32, #tpu.memory_space<vmem>>, vector<1x16xf32>
    %cst_9 = arith.constant dense<0.000000e+00> : vector<32x16xf32>
    %9 = tpu.matmul %6, %7, %cst_9 {dimension_numbers = #tpu.dot_dimension_numbers<[1], [0], [0], [1], [0, 0, 1, 1], [], []>} : vector<32x24xf32>, vector<24x16xf32>, vector<32x16xf32> -> vector<32x16xf32>
    %10 = vector.broadcast %8 : vector<1x16xf32> to vector<32x16xf32>
    %11 = arith.addf %9, %10 : vector<32x16xf32>
    %c0_10 = arith.constant 0 : index
    %c0_11 = arith.constant 0 : index
    %12 = vector.load %arg7[%c0_10, %c0_11] : memref<16x16xf32, #tpu.memory_space<vmem>>, vector<16x16xf32>
    %c0_12 = arith.constant 0 : index
    %c0_13 = arith.constant 0 : index
    %13 = vector.load %arg8[%c0_12, %c0_13] : memref<1x16xf32, #tpu.memory_space<vmem>>, vector<1x16xf32>
    %cst_14 = arith.constant dense<0.000000e+00> : vector<32x16xf32>
    %14 = tpu.matmul %11, %12, %cst_14 {dimension_numbers = #tpu.dot_dimension_numbers<[1], [0], [0], [1], [0, 0, 1, 1], [], []>} : vector<32x16xf32>, vector<16x16xf32>, vector<32x16xf32> -> vector<32x16xf32>
    %15 = vector.broadcast %13 : vector<1x16xf32> to vector<32x16xf32>
    %16 = arith.addf %14, %15 : vector<32x16xf32>
    %c0_15 = arith.constant 0 : index
    %c0_16 = arith.constant 0 : index
    %17 = vector.load %arg16[%c0_15, %c0_16] : memref<32x16xf32, #tpu.memory_space<vmem>>, vector<32x16xf32>
    tpu.vector_store %arg16[%c0_15, %c0_16], %16 {strides = array<i32>} : memref<32x16xf32, #tpu.memory_space<vmem>>, vector<32x16xf32>,
    %18 = vector.extract_strided_slice %16 {offsets = [0, 0], sizes = [32, 8], strides = [1, 1]} : vector<32x16xf32> to vector<32x8xf32>
    %19 = vector.extract_strided_slice %16 {offsets = [0, 8], sizes = [32, 8], strides = [1, 1]} : vector<32x16xf32> to vector<32x8xf32>
    %c0_17 = arith.constant 0 : index
    %c0_18 = arith.constant 0 : index
    %20 = vector.load %arg2[%c0_17, %c0_18] : memref<32x8xf32, #tpu.memory_space<vmem>>, vector<32x8xf32>
    %cst_19 = arith.constant 5.000000e-01 : f32
    %21 = vector.broadcast %cst_19 : f32 to vector<32x8xf32>
    %22 = arith.mulf %21, %19 : vector<32x8xf32>
    %23 = math.exp %22 : vector<32x8xf32>
    %24 = arith.mulf %20, %23 : vector<32x8xf32>
    %25 = arith.addf %18, %24 : vector<32x8xf32>
    %c0_20 = arith.constant 0 : index
    %c0_21 = arith.constant 0 : index
    %26 = vector.load %arg9[%c0_20, %c0_21] : memref<8x16xf32, #tpu.memory_space<vmem>>, vector<8x16xf32>
    %c0_22 = arith.constant 0 : index
    %c0_23 = arith.constant 0 : index
    %27 = vector.load %arg10[%c0_22, %c0_23] : memref<1x16xf32, #tpu.memory_space<vmem>>, vector<1x16xf32>
    %cst_24 = arith.constant dense<0.000000e+00> : vector<32x16xf32>
    %28 = tpu.matmul %25, %26, %cst_24 {dimension_numbers = #tpu.dot_dimension_numbers<[1], [0], [0], [1], [0, 0, 1, 1], [], []>} : vector<32x8xf32>, vector<8x16xf32>, vector<32x16xf32> -> vector<32x16xf32>
    %29 = vector.broadcast %27 : vector<1x16xf32> to vector<32x16xf32>
    %30 = arith.addf %28, %29 : vector<32x16xf32>
    %31 = math.tanh %30 : vector<32x16xf32>
    %c0_25 = arith.constant 0 : index
    %c0_26 = arith.constant 0 : index
    %32 = vector.load %arg11[%c0_25, %c0_26] : memref<16x24xf32, #tpu.memory_space<vmem>>, vector<16x24xf32>
    %c0_27 = arith.constant 0 : index
    %c0_28 = arith.constant 0 : index
    %33 = vector.load %arg12[%c0_27, %c0_28] : memref<1x24xf32, #tpu.memory_space<vmem>>, vector<1x24xf32>
    %cst_29 = arith.constant dense<0.000000e+00> : vector<32x24xf32>
    %34 = tpu.matmul %31, %32, %cst_29 {dimension_numbers = #tpu.dot_dimension_numbers<[1], [0], [0], [1], [0, 0, 1, 1], [], []>} : vector<32x16xf32>, vector<16x24xf32>, vector<32x24xf32> -> vector<32x24xf32>
    %35 = vector.broadcast %33 : vector<1x24xf32> to vector<32x24xf32>
    %36 = arith.addf %34, %35 : vector<32x24xf32>
    %37 = math.tanh %36 : vector<32x24xf32>
    %c0_30 = arith.constant 0 : index
    %c0_31 = arith.constant 0 : index
    %38 = vector.load %arg13[%c0_30, %c0_31] : memref<24x32xf32, #tpu.memory_space<vmem>>, vector<24x32xf32>
    %c0_32 = arith.constant 0 : index
    %c0_33 = arith.constant 0 : index
    %39 = vector.load %arg14[%c0_32, %c0_33] : memref<1x32xf32, #tpu.memory_space<vmem>>, vector<1x32xf32>
    %cst_34 = arith.constant dense<0.000000e+00> : vector<32x32xf32>
    %40 = tpu.matmul %37, %38, %cst_34 {dimension_numbers = #tpu.dot_dimension_numbers<[1], [0], [0], [1], [0, 0, 1, 1], [], []>} : vector<32x24xf32>, vector<24x32xf32>, vector<32x32xf32> -> vector<32x32xf32>
    %41 = vector.broadcast %39 : vector<1x32xf32> to vector<32x32xf32>
    %42 = arith.addf %40, %41 : vector<32x32xf32>
    %c0_35 = arith.constant 0 : index
    %c0_36 = arith.constant 0 : index
    %43 = vector.load %arg15[%c0_35, %c0_36] : memref<32x32xf32, #tpu.memory_space<vmem>>, vector<32x32xf32>
    tpu.vector_store %arg15[%c0_35, %c0_36], %42 {strides = array<i32>} : memref<32x32xf32, #tpu.memory_space<vmem>>, vector<32x32xf32>,
    return
  }
  func.func @transform_0(%arg0: i32) -> (i32, i32) {
    %c0_i32 = arith.constant 0 : i32
    %c0_i32_0 = arith.constant 0 : i32
    return %arg0, %c0_i32 : i32, i32
  }
  func.func @transform_1(%arg0: i32) -> (i32, i32) {
    %c0_i32 = arith.constant 0 : i32
    %c0_i32_0 = arith.constant 0 : i32
    return %arg0, %c0_i32 : i32, i32
  }
  func.func @transform_2(%arg0: i32) -> (i32, i32) {
    %c0_i32 = arith.constant 0 : i32
    %c0_i32_0 = arith.constant 0 : i32
    %c0_i32_1 = arith.constant 0 : i32
    return %c0_i32, %c0_i32_0 : i32, i32
  }
  func.func @transform_3(%arg0: i32) -> (i32, i32) {
    %c0_i32 = arith.constant 0 : i32
    %c0_i32_0 = arith.constant 0 : i32
    %c0_i32_1 = arith.constant 0 : i32
    return %c0_i32, %c0_i32_0 : i32, i32
  }
  func.func @transform_4(%arg0: i32) -> (i32, i32) {
    %c0_i32 = arith.constant 0 : i32
    %c0_i32_0 = arith.constant 0 : i32
    %c0_i32_1 = arith.constant 0 : i32
    return %c0_i32, %c0_i32_0 : i32, i32
  }
  func.func @transform_5(%arg0: i32) -> (i32, i32) {
    %c0_i32 = arith.constant 0 : i32
    %c0_i32_0 = arith.constant 0 : i32
    %c0_i32_1 = arith.constant 0 : i32
    return %c0_i32, %c0_i32_0 : i32, i32
  }
  func.func @transform_6(%arg0: i32) -> (i32, i32) {
    %c0_i32 = arith.constant 0 : i32
    %c0_i32_0 = arith.constant 0 : i32
    %c0_i32_1 = arith.constant 0 : i32
    return %c0_i32, %c0_i32_0 : i32, i32
  }
  func.func @transform_7(%arg0: i32) -> (i32, i32) {
    %c0_i32 = arith.constant 0 : i32
    %c0_i32_0 = arith.constant 0 : i32
    %c0_i32_1 = arith.constant 0 : i32
    return %c0_i32, %c0_i32_0 : i32, i32
  }
  func.func @transform_8(%arg0: i32) -> (i32, i32) {
    %c0_i32 = arith.constant 0 : i32
    %c0_i32_0 = arith.constant 0 : i32
    %c0_i32_1 = arith.constant 0 : i32
    return %c0_i32, %c0_i32_0 : i32, i32
  }
  func.func @transform_9(%arg0: i32) -> (i32, i32) {
    %c0_i32 = arith.constant 0 : i32
    %c0_i32_0 = arith.constant 0 : i32
    %c0_i32_1 = arith.constant 0 : i32
    return %c0_i32, %c0_i32_0 : i32, i32
  }
  func.func @transform_10(%arg0: i32) -> (i32, i32) {
    %c0_i32 = arith.constant 0 : i32
    %c0_i32_0 = arith.constant 0 : i32
    %c0_i32_1 = arith.constant 0 : i32
    return %c0_i32, %c0_i32_0 : i32, i32
  }
  func.func @transform_11(%arg0: i32) -> (i32, i32) {
    %c0_i32 = arith.constant 0 : i32
    %c0_i32_0 = arith.constant 0 : i32
    %c0_i32_1 = arith.constant 0 : i32
    return %c0_i32, %c0_i32_0 : i32, i32
  }
  func.func @transform_12(%arg0: i32) -> (i32, i32) {
    %c0_i32 = arith.constant 0 : i32
    %c0_i32_0 = arith.constant 0 : i32
    %c0_i32_1 = arith.constant 0 : i32
    return %c0_i32, %c0_i32_0 : i32, i32
  }
  func.func @transform_13(%arg0: i32) -> (i32, i32) {
    %c0_i32 = arith.constant 0 : i32
    %c0_i32_0 = arith.constant 0 : i32
    %c0_i32_1 = arith.constant 0 : i32
    return %c0_i32, %c0_i32_0 : i32, i32
  }
  func.func @transform_14(%arg0: i32) -> (i32, i32) {
    %c0_i32 = arith.constant 0 : i32
    %c0_i32_0 = arith.constant 0 : i32
    return %arg0, %c0_i32 : i32, i32
  }
  func.func @transform_15(%arg0: i32) -> (i32, i32) {
    %c0_i32 = arith.constant 0 : i32
    %c0_i32_0 = arith.constant 0 : i32
    return %arg0, %c0_i32 : i32, i32
  }
}

</mosaic_0001>

<bundles_post_ra>
// kernel: tpu_custom_call.1
= control target key start
LH: loop header
LB: loop body
LE: loop exit
PB: predicated region body
PF: predicated region fallthrough
CT: control target
= control target key end

     0   :  { %s1167_s18 = smov 0   ;;  %s1291_s0 = inlined_call_operand.vmem [shape: f32[64,32], index: 0, kind: input, shape index: {}]   ;;  %s1292_s1 = inlined_call_operand.vmem [shape: f32[64,8], index: 1, kind: input, shape index: {}]   ;;  %s1293_s2 = inlined_call_operand.vmem [shape: f32[32,24], index: 2, kind: input, shape index: {}]   ;;  %s1294_s3 = inlined_call_operand.vmem [shape: f32[1,24], index: 3, kind: input, shape index: {}]   ;;  %s1295_s4 = inlined_call_operand.vmem [shape: f32[24,16], index: 4, kind: input, shape index: {}]   ;;  %s1296_s5 = inlined_call_operand.vmem [shape: f32[1,16], index: 5, kind: input, shape index: {}]   ;;  %s1297_s6 = inlined_call_operand.vmem [shape: f32[16,16], index: 6, kind: input, shape index: {}]   ;;  %s1298_s7 = inlined_call_operand.vmem [shape: f32[1,16], index: 7, kind: input, shape index: {}]   ;;  %s1299_s8 = inlined_call_operand.vmem [shape: f32[8,16], index: 8, kind: input, shape index: {}]   ;;  %s1300_s9 = inlined_call_operand.vmem [shape: f32[1,16], index: 9, kind: input, shape index: {}]   ;;  %s1301_s10 = inlined_call_operand.vmem [shape: f32[16,24], index: 10, kind: input, shape index: {}]   ;;  %s1302_s11 = inlined_call_operand.vmem [shape: f32[1,24], index: 11, kind: input, shape index: {}]   ;;  %s1303_s12 = inlined_call_operand.vmem [shape: f32[24,32], index: 12, kind: input, shape index: {}]   ;;  %s1304_s13 = inlined_call_operand.vmem [shape: f32[1,32], index: 13, kind: input, shape index: {}]   ;;  %s1305_s14 = inlined_call_operand.vmem [shape: f32[64,32], index: 14, kind: output, shape index: {0}]   ;;  %s1306_s15 = inlined_call_operand.vmem [shape: f32[64,16], index: 15, kind: output, shape index: {1}]  }
   0x1 LB: > { %s989_s19 = sadd.s32 4294967295, %s1084_s18   ;;  %p993_p0 = scmp.ge.s32.totalorder %s1084_s18, 1  ;;  %s1084_s18 = sphi %s1167_s18, %s26_s18  }
   0x2   : > { %p452_p1 = scmp.lt.s32.totalorder %s1084_s18, 3 }
   0x4   : > { %p453_p2 = pnand %p993_p0, %p452_p1 }
   0x5   : > { %s994_s24 = sshll.u32 (!%p453_p2), %s989_s19, 2  ;;  %s1086_s27 = smov (!%p453_p2), 120  }
   0x6   : > { %456 = sbr.rel (%p453_p2) target bundleno = 987 (0x3db), region = 76  ;;  %p511_p3 = scmp.lt.s32.totalorder (!%p453_p2), %s994_s24, 7 }
   0xb   : > { %v541_v0 = vld [vmem:[%s1293_s2 + $0x18] sm:$0xff]  ;;  %v540_v1 = vld [vmem:[%s1293_s2 + $0x10] sm:$0xff]  ;;  %v539_v2 = vld [vmem:[%s1293_s2 + $0x8] sm:$0xff]  ;;  %s1308_s24 = smov (!%p511_p3, %s994_s24), 7  ;;  %vm546_vm0 = vcmask 261120   ;;  %vm599_vm1 = vcmask 195584  }
   0xc   : > { %571 = vmatpush.msra.mxu0 %v541_v0  ;;  %v538_v3 = vld [vmem:[%s1293_s2] sm:$0xff]  ;;  %s1187_s29 = sshll.u32 %s1308_s24, 3  ;;  %v594_v8 = vld [vmem:[%s1295_s4 + $0x10] sm:$0xff]  ;;  %v593_v9 = vld [vmem:[%s1295_s4 + $0x8] sm:$0xff]  ;;  %vm647_vm2 = vcmask 130048   ;;  %vm738_vm3 = vcmask 64512  }
   0xd   : > { %s514_s17 = scalar_lea.vmem %s1291_s0, %s1187_s29  ;;  %625 = vmatpush.msra.mxu1 %v594_v8  ;;  %v592_v10 = vld [vmem:[%s1295_s4] sm:$0xff]  ;;  %v642_v14 = vld [vmem:[%s1297_s6 + $0x8] sm:$0xff]  ;;  %s532_s24 = scalar_lea.vmem %s1306_s15, %s1187_s29 }
   0xe   : > { %572 = vmatpush.msra.mxu0 %v540_v1  ;;  %v534_v4 = vld [vmem:[%s514_s17] sm:$0xff]  ;;  %v535_v5 = vld [vmem:[%s514_s17 + $0x8] sm:$0xff]  ;;  %v536_v6 = vld [vmem:[%s514_s17 + $0x10] sm:$0xff]  ;;  %1028 = vmatpush.msra.mxu2 %v642_v14  ;;  %s520_s16 = scalar_lea.vmem %s1292_s1, %s1187_s29  ;;  %s526_s23 = scalar_lea.vmem %s1305_s14, %s1187_s29 }
   0xf   : > { %v537_v7 = vld [vmem:[%s514_s17 + $0x18] sm:$0xff]  ;;  %626 = vmatpush.msra.mxu1 %v593_v9  ;;  %v1040_v11 = vld [vmem:[%s1294_s3] ss:$0 sm:$0xff]  ;;  %v785_v61 = vld [vmem:[%s1301_s10 + $0x8] sm:$0xff] }
  0x10   : > { %573 = vmatpush.msra.mxu0 %v539_v2  ;;  %v641_v15 = vld [vmem:[%s1297_s6] sm:$0xff]  ;;  %v694_v62 = vld [vmem:[%s520_s16 + $0x8] sm:$0xff]  ;;  %v695_v2 = vld [vmem:[%s520_s16 + $0x10] sm:$0xff] }
  0x11   : > { %627 = vmatpush.msra.mxu1 %v592_v10  ;;  %1029 = vmatpush.msra.mxu2 %v641_v15  ;;  %v1041_v26 = vld [vmem:[%s1296_s5] ss:$0 sm:$0xff] }
  0x12   : > { %574 = vmatpush.msra.mxu0 %v538_v3  ;;  %v1042_v35 = vld [vmem:[%s1298_s7] ss:$0 sm:$0xff] }
  0x13   : > { %1002 = vmatmul.msk.f32.vlgmr.msra.gmra.mxu0 %vm546_vm0, %v534_v4  ;;  %674 = vmatpush.msrb.mxu1 %v642_v14  ;;  %v733_v40 = vld [vmem:[%s1299_s8] sm:$0xff] }
  0x14   : > { %766 = vmatpush.msrb.mxu0 %v733_v40  ;;  %1030 = vmatpush.msra.mxu3 %v733_v40  ;;  %v693_v57 = vld [vmem:[%s520_s16] sm:$0xff] }
  0x15   : > { %675 = vmatpush.msrb.mxu1 %v641_v15  ;;  %v784_v10 = vld [vmem:[%s1301_s10] sm:$0xff]  ;;  %v837_v15 = vld [vmem:[%s1303_s12 + $0x10] sm:$0xff] }
  0x16   : > { %816 = vmatpush.msrb.mxu3 %v785_v61  ;;  %867 = vmatpush.msrb.mxu2 %v837_v15  ;;  %v1045_v40 = vld [vmem:[%s1304_s13] ss:$0 sm:$0xff] }
  0x18   : > { %817 = vmatpush.msrb.mxu3 %v784_v10 }
  0x1b   : > { %1003 = vmatmul.msk.f32.gmra.mxu0 %vm546_vm0, %v535_v5 }
  0x23   : > { %1004 = vmatmul.msk.f32.gmra.mxu0 %vm546_vm0, %v536_v6  ;;  %v696_v6 = vld [vmem:[%s520_s16 + $0x18] sm:$0xff] }
  0x2b   : > { %1005 = vmatmul.msk.f32.gmra.mxu0 %vm546_vm0, %v537_v7 }
  0x90   : > { %v576_v12 = vpop.f32.mrf.mxu0 }
  0x91   : > { %v577_v13 = vadd.f32 %v1040_v11, %v576_v12 }
  0x93   : > { %1046 = vtanh.f32 %v577_v13 }
  0x98   : > { %v579_v16 = vpop.f32.mrf.mxu0 }
  0x99   : > { %v1047_v17 = vpop.eup %1046  ;;  %v580_v18 = vadd.f32 %v1040_v11, %v579_v16 }
  0x9a   : > { %1006 = vmatmul.msk.f32.vlgmr.msra.gmra.mxu1 %vm599_vm1, %v1047_v17 }
  0x9b   : > { %1048 = vtanh.f32 %v580_v18 }
  0xa0   : > { %v582_v19 = vpop.f32.mrf.mxu0 }
  0xa1   : > { %v1049_v20 = vpop.eup %1048  ;;  %v583_v21 = vadd.f32 %v1040_v11, %v582_v19 }
  0xa2   : > { %1007 = vmatmul.msk.f32.gmra.mxu1 %vm599_vm1, %v1049_v20 }
  0xa3   : > { %1050 = vtanh.f32 %v583_v21 }
  0xa8   : > { %v585_v22 = vpop.f32.mrf.mxu0 }
  0xa9   : > { %v1051_v23 = vpop.eup %1050  ;;  %v586_v24 = vadd.f32 %v1040_v11, %v585_v22  ;;  %v1043_v11 = vld [vmem:[%s1300_s9] ss:$0 sm:$0xff] }
  0xaa   : > { %1008 = vmatmul.msk.f32.gmra.mxu1 %vm599_vm1, %v1051_v23 }
  0xab   : > { %1052 = vtanh.f32 %v586_v24 }
  0xb1   : > { %v1053_v25 = vpop.eup %1052 }
  0xb2   : > { %1009 = vmatmul.msk.f32.gmra.mxu1 %vm599_vm1, %v1053_v25  ;;  %v836_v25 = vld [vmem:[%s1303_s12 + $0x8] sm:$0xff] }
  0xb3   : > { %868 = vmatpush.msrb.mxu2 %v836_v25 }
 0x117   : > { %v629_v27 = vpop.f32.mrf.mxu1 }
 0x118   : > { %v630_v28 = vadd.f32 %v1041_v26, %v629_v27  ;;  %v1044_v27 = vld [vmem:[%s1302_s11] ss:$0 sm:$0xff] }
 0x11a   : > { %1010 = vmatmul.msk.f32.vlgmr.msrb.gmra.mxu1 %vm647_vm2, %v630_v28 }
 0x11f   : > { %v632_v29 = vpop.f32.mrf.mxu1 }
 0x120   : > { %v633_v30 = vadd.f32 %v1041_v26, %v632_v29 }
 0x122   : > { %1011 = vmatmul.msk.f32.vlgmr.msra.gmra.mxu2 %vm647_vm2, %v633_v30 }
 0x127   : > { %v635_v31 = vpop.f32.mrf.mxu1 }
 0x128   : > { %v636_v32 = vadd.f32 %v1041_v26, %v635_v31 }
 0x12a   : > { %1012 = vmatmul.msk.f32.gmra.mxu2 %vm647_vm2, %v636_v32 }
 0x12f   : > { %v638_v33 = vpop.f32.mrf.mxu1 }
 0x130   : > { %v639_v34 = vadd.f32 %v1041_v26, %v638_v33  ;;  %v835_v26 = vld [vmem:[%s1303_s12] sm:$0xff] }
 0x131   : > { %869 = vmatpush.msrb.mxu2 %v835_v26 }
 0x132   : > { %1013 = vmatmul.msk.f32.gmra.mxu2 %vm647_vm2, %v639_v34 }
 0x197   : > { %v677_v36 = vpop.f32.mrf.mxu1 }
 0x198   : > { %v678_v37 = vadd.f32 %v1042_v35, %v677_v36 }
 0x19a   : > { %689 = vst.msk [vmem:[%s532_s24] sm:$0xff] %vm647_vm2, %v678_v37  ;;  %v697_v38 = vmul.f32 0.5, %v678_v37 }
 0x19c   : > { %v701_v39 = vmul.f32 1.442695, %v697_v38 }
 0x19e   : > { %1054 = vpow2.f32 %v701_v39 }
 0x1a4   : > { %v1055_v41 = vpop.eup %1054 }
 0x1a5   : > { %v680_v42 = vpop.f32.mrf.mxu2  ;;  %713 = vrot.lane.b32.xlu0 %v1055_v41, %s1086_s27 }
 0x1a6   : > { %v681_v43 = vadd.f32 %v1042_v35, %v680_v42 }
 0x1a8   : > { %690 = vst.msk [vmem:[%s532_s24 + $0x8] sm:$0xff] %vm647_vm2, %v681_v43  ;;  %v698_v44 = vmul.f32 0.5, %v681_v43 }
 0x1aa   : > { %v703_v45 = vmul.f32 1.442695, %v698_v44 }
 0x1ac   : > { %1056 = vpow2.f32 %v703_v45 }
 0x1ad   : > { %v683_v46 = vpop.f32.mrf.mxu2 }
 0x1ae   : > { %v684_v47 = vadd.f32 %v1042_v35, %v683_v46 }
 0x1b0   : > { %691 = vst.msk [vmem:[%s532_s24 + $0x10] sm:$0xff] %vm647_vm2, %v684_v47  ;;  %v699_v48 = vmul.f32 0.5, %v684_v47 }
 0x1b2   : > { %v1057_v49 = vpop.eup %1056  ;;  %v705_v50 = vmul.f32 1.442695, %v699_v48 }
 0x1b3   : > { %715 = vrot.lane.b32.xlu0 %v1057_v49, %s1086_s27 }
 0x1b4   : > { %1058 = vpow2.f32 %v705_v50 }
 0x1b5   : > { %v686_v51 = vpop.f32.mrf.mxu2 }
 0x1b6   : > { %v687_v52 = vadd.f32 %v1042_v35, %v686_v51 }
 0x1b8   : > { %692 = vst.msk [vmem:[%s532_s24 + $0x18] sm:$0xff] %vm647_vm2, %v687_v52  ;;  %v700_v53 = vmul.f32 0.5, %v687_v52 }
 0x1ba   : > { %v1059_v54 = vpop.eup %1058  ;;  %v707_v55 = vmul.f32 1.442695, %v700_v53 }
 0x1bb   : > { %717 = vrot.lane.b32.xlu1 %v1059_v54, %s1086_s27 }
 0x1bc   : > { %1060 = vpow2.f32 %v707_v55 }
 0x1c2   : > { %v1061_v56 = vpop.eup %1060 }
 0x1c3   : > { %719 = vrot.lane.b32.xlu1 %v1061_v56, %s1086_s27 }
 0x217   : > { %v714_v58 = vpop.permute.xlu0 %713 }
 0x218   : > { %v725_v59 = vmul.f32 %v714_v58, %v693_v57 }
 0x21a   : > { %v729_v60 = vadd.f32 %v725_v59, %v678_v37 }
 0x21c   : > { %1014 = vmatmul.msk.f32.vlgmr.msrb.gmra.mxu0 %vm738_vm3, %v729_v60 }
 0x225   : > { %v716_v63 = vpop.permute.xlu0 %715 }
 0x226   : > { %v726_v0 = vmul.f32 %v716_v63, %v694_v62 }
 0x228   : > { %v730_v1 = vadd.f32 %v726_v0, %v681_v43 }
 0x22a   : > { %1015 = vmatmul.msk.f32.vlgmr.msra.gmra.mxu3 %vm738_vm3, %v730_v1 }
 0x22d   : > { %v718_v3 = vpop.permute.xlu1 %717 }
 0x22e   : > { %v727_v4 = vmul.f32 %v718_v3, %v695_v2 }
 0x230   : > { %v731_v5 = vadd.f32 %v727_v4, %v684_v47 }
 0x232   : > { %1016 = vmatmul.msk.f32.gmra.mxu3 %vm738_vm3, %v731_v5 }
 0x235   : > { %v720_v7 = vpop.permute.xlu1 %719 }
 0x236   : > { %v728_v8 = vmul.f32 %v720_v7, %v696_v6 }
 0x238   : > { %v732_v9 = vadd.f32 %v728_v8, %v687_v52 }
 0x23a   : > { %1017 = vmatmul.msk.f32.gmra.mxu3 %vm738_vm3, %v732_v9 }
 0x299   : > { %v768_v12 = vpop.f32.mrf.mxu0 }
 0x29a   : > { %v769_v13 = vadd.f32 %v1043_v11, %v768_v12 }
 0x29c   : > { %1062 = vtanh.f32 %v769_v13 }
 0x2a2   : > { %v1063_v14 = vpop.eup %1062 }
 0x2a3   : > { %1018 = vmatmul.msk.f32.vlgmr.msrb.gmra.mxu3 %vm647_vm2, %v1063_v14 }
 0x2ad   : > { %v771_v16 = vpop.f32.mrf.mxu3 }
 0x2ae   : > { %v772_v17 = vadd.f32 %v1043_v11, %v771_v16 }
 0x2b0   : > { %1064 = vtanh.f32 %v772_v17 }
 0x2b5   : > { %v774_v18 = vpop.f32.mrf.mxu3 }
 0x2b6   : > { %v1065_v19 = vpop.eup %1064  ;;  %v775_v20 = vadd.f32 %v1043_v11, %v774_v18 }
 0x2b7   : > { %1019 = vmatmul.msk.f32.gmra.mxu3 %vm647_vm2, %v1065_v19 }
 0x2b8   : > { %1066 = vtanh.f32 %v775_v20 }
 0x2bd   : > { %v777_v21 = vpop.f32.mrf.mxu3 }
 0x2be   : > { %v1067_v22 = vpop.eup %1066  ;;  %v778_v23 = vadd.f32 %v1043_v11, %v777_v21 }
 0x2bf   : > { %1020 = vmatmul.msk.f32.gmra.mxu3 %vm647_vm2, %v1067_v22 }
 0x2c0   : > { %1068 = vtanh.f32 %v778_v23 }
 0x2c6   : > { %v1069_v24 = vpop.eup %1068 }
 0x2c7   : > { %1021 = vmatmul.msk.f32.gmra.mxu3 %vm647_vm2, %v1069_v24 }
 0x326   : > { %v819_v28 = vpop.f32.mrf.mxu3 }
 0x327   : > { %v820_v29 = vadd.f32 %v1044_v27, %v819_v28 }
 0x329   : > { %1070 = vtanh.f32 %v820_v29 }
 0x32f   : > { %v1071_v30 = vpop.eup %1070 }
 0x330   : > { %1022 = vmatmul.msk.f32.vlgmr.msrb.gmra.mxu2 %vm599_vm1, %v1071_v30 }
 0x33a   : > { %v822_v31 = vpop.f32.mrf.mxu3 }
 0x33b   : > { %v823_v32 = vadd.f32 %v1044_v27, %v822_v31 }
 0x33d   : > { %1072 = vtanh.f32 %v823_v32 }
 0x342   : > { %v825_v33 = vpop.f32.mrf.mxu3 }
 0x343   : > { %v1073_v34 = vpop.eup %1072  ;;  %v826_v35 = vadd.f32 %v1044_v27, %v825_v33 }
 0x344   : > { %1023 = vmatmul.msk.f32.gmra.mxu2 %vm599_vm1, %v1073_v34 }
 0x345   : > { %1074 = vtanh.f32 %v826_v35 }
 0x34a   : > { %v828_v36 = vpop.f32.mrf.mxu3 }
 0x34b   : > { %v1075_v37 = vpop.eup %1074  ;;  %v829_v38 = vadd.f32 %v1044_v27, %v828_v36 }
 0x34c   : > { %1024 = vmatmul.msk.f32.gmra.mxu2 %vm599_vm1, %v1075_v37 }
 0x34d   : > { %1076 = vtanh.f32 %v829_v38 }
 0x353   : > { %v1077_v39 = vpop.eup %1076 }
 0x354   : > { %1025 = vmatmul.msk.f32.gmra.mxu2 %vm599_vm1, %v1077_v39 }
 0x3b3   : > { %v871_v41 = vpop.f32.mrf.mxu2 }
 0x3b4   : > { %v872_v42 = vadd.f32 %v1045_v40, %v871_v41 }
 0x3b6   : > { %883 = vst.msk [vmem:[%s526_s23] sm:$0xff] %vm546_vm0, %v872_v42 }
 0x3c7   : > { %v874_v43 = vpop.f32.mrf.mxu2 }
 0x3c8   : > { %v875_v44 = vadd.f32 %v1045_v40, %v874_v43 }
 0x3ca   : > { %884 = vst.msk [vmem:[%s526_s23 + $0x8] sm:$0xff] %vm546_vm0, %v875_v44 }
 0x3cf   : > { %v877_v45 = vpop.f32.mrf.mxu2 }
 0x3d0   : > { %v878_v46 = vadd.f32 %v1045_v40, %v877_v45 }
 0x3d2   : > { %885 = vst.msk [vmem:[%s526_s23 + $0x10] sm:$0xff] %vm546_vm0, %v878_v46 }
 0x3d7   : > { %v880_v47 = vpop.f32.mrf.mxu2 }
 0x3d8   : > { %v881_v48 = vadd.f32 %v1045_v40, %v880_v47 }
 0x3da   : > { %886 = vst.msk [vmem:[%s526_s23 + $0x18] sm:$0xff] %vm546_vm0, %v881_v48 }
 0x3db PF: > { %s26_s18 = sadd.s32 1, %s1084_s18  }
 0x3dc   : > { %p23_p4 = scmp.ge.s32.totalorder %s26_s18, 4  }
 0x3de   :  { %25 = sbr.rel (!%p23_p4) target bundleno = 1 (0x1), region = 121 }

</bundles_post_ra>
